<compile_context>
chip_gen: v7x
topology: tpu7x:2x2x1
jax: 0.10.0
libtpu: 0.0.40
codegen_flags: <defaults>
</compile_context>

<pallas_src>
import functools
import math

import jax
import jax.numpy as jnp
from jax.experimental import pallas as pl
from jax.experimental.pallas import tpu as pltpu


_SUBLANE = 16          # row-tile granularity (mult. of 8 for f32, 16 for bf16 packing)
_NEG_INF = -1e9        # finite mask fill (avoids inf-inf NaNs in online softmax)


# ----------------------------------------------------------------------------- utils
def _round_up(x, m):
    return (x + m - 1) // m * m


def _pad2d(x, rows, cols):
    r, c = x.shape
    if r == rows and c == cols:
        return x
    return jnp.pad(x, ((0, rows - r), (0, cols - c)))


@functools.lru_cache(maxsize=1)
def _gen_defaults():
    """Generation-dependent VMEM limit and matmul tile defaults."""
    vmem_bytes = None
    try:
        info = pltpu.get_tpu_info()
        vmem_bytes = int(getattr(info, "vmem_capacity_bytes", 0)) or None
    except Exception:
        vmem_bytes = None
    if vmem_bytes is not None and vmem_bytes >= (100 << 20):      # v5e / v6e (128 MiB)
        return {"vmem_limit": 96 << 20, "tm": 512, "tn": 512, "tk": 1024}
    # v7x (64 MiB / TensorCore) or unknown backend: conservative sizing.
    return {"vmem_limit": 48 << 20, "tm": 256, "tn": 256, "tk": 512}


def _row_tile(R, tm_default):
    """Pick a row tile: <= generation default, multiple of _SUBLANE, prefer >=2 tiles."""
    tm = min(tm_default, _round_up(max(R, _SUBLANE), _SUBLANE))
    Rp = _round_up(max(R, _SUBLANE), tm)
    while Rp // tm < 2 and tm >= 2 * _SUBLANE:
        tm = _round_up(tm // 2, _SUBLANE)
        Rp = _round_up(max(R, _SUBLANE), tm)
    return tm, Rp


# ------------------------------------------------------------------- standalone RMSNorm
def _rmsnorm_kernel(x_ref, w_ref, o_ref, *, eps, h_real, input_dtype):
    x = x_ref[...].astype(jnp.float32)
    var = jnp.sum(x * x, axis=-1, keepdims=True) * (1.0 / h_real)   # padded lanes are 0
    normed = x * jax.lax.rsqrt(var + eps)
    if input_dtype != jnp.float32:
        normed = normed.astype(input_dtype).astype(jnp.float32)     # PyTorch parity
    o_ref[...] = (w_ref[...].astype(jnp.float32) * normed).astype(o_ref.dtype)


def adapter_rms_norm(hidden_states, weight, eps=1e-6, block_rows=None):
    """AdapterRMSNorm.forward (T5LayerNorm), row-tiled, lane-dense output."""
    d = _gen_defaults()
    orig_shape = hidden_states.shape
    dtype = hidden_states.dtype
    H = orig_shape[-1]
    x2d = hidden_states.reshape(-1, H)
    R = x2d.shape[0]

    Hp = _round_up(max(H, 128), 128)
    if block_rows is None:
        budget = 32 * 1024 * 1024
        per_row = Hp * 4 * 4
        block_rows = max(_SUBLANE, min(1024, budget // per_row))
    block_rows = _round_up(block_rows, _SUBLANE)
    Rp = _round_up(max(R, _SUBLANE), block_rows)
    while Rp // block_rows < 2 and block_rows > _SUBLANE:
        block_rows = max(_SUBLANE, block_rows // 2)
        Rp = _round_up(max(R, _SUBLANE), block_rows)

    xp = _pad2d(x2d, Rp, Hp)
    wp = _pad2d(weight.reshape(1, H), 1, Hp)

    itemsize = jnp.dtype(dtype).itemsize
    cost = pl.CostEstimate(flops=int(3 * R * H), transcendentals=int(R),
                           bytes_accessed=int(2 * R * H * itemsize))

    out = pl.pallas_call(
        functools.partial(_rmsnorm_kernel, eps=eps, h_real=float(H), input_dtype=dtype),
        out_shape=jax.ShapeDtypeStruct((Rp, Hp), dtype),
        grid_spec=pltpu.PrefetchScalarGridSpec(
            num_scalar_prefetch=0,
            grid=(Rp // block_rows,),
            in_specs=[pl.BlockSpec((block_rows, Hp), lambda i: (i, 0)),
                      pl.BlockSpec((1, Hp), lambda i: (0, 0))],
            out_specs=pl.BlockSpec((block_rows, Hp), lambda i: (i, 0)),
        ),
        compiler_params=pltpu.CompilerParams(
            dimension_semantics=("parallel",),
            vmem_limit_bytes=int(d["vmem_limit"]),
        ),
        cost_estimate=cost,
    )(xp, wp)
    return out[:R, :H].reshape(orig_shape)


# ----------------------------------------------------------- per-row inverse-RMS scale
def _row_scale_kernel(x_ref, o_ref, ssq_ref, *, eps, h_real):
    @pl.when(pl.program_id(1) == 0)
    def _():
        ssq_ref[...] = jnp.zeros_like(ssq_ref)
    x = x_ref[...].astype(jnp.float32)
    ssq_ref[...] += jnp.sum(x * x, axis=-1, keepdims=True)

    @pl.when(pl.program_id(1) == pl.num_programs(1) - 1)
    def _():
        o_ref[...] = jax.lax.rsqrt(ssq_ref[...] * (1.0 / h_real) + eps)


def _row_inv_rms(xp, R, H, tm, Rp, tk, Kp, eps, vmem_limit):
    return pl.pallas_call(
        functools.partial(_row_scale_kernel, eps=eps, h_real=float(H)),
        out_shape=jax.ShapeDtypeStruct((Rp, 1), jnp.float32),
        grid_spec=pltpu.PrefetchScalarGridSpec(
            num_scalar_prefetch=0,
            grid=(Rp // tm, Kp // tk),
            in_specs=[pl.BlockSpec((tm, tk), lambda i, k: (i, k))],
            out_specs=pl.BlockSpec((tm, 1), lambda i, k: (i, 0)),
            scratch_shapes=[pltpu.VMEM((tm, 1), jnp.float32)],
        ),
        compiler_params=pltpu.CompilerParams(
            dimension_semantics=("parallel", "arbitrary"),
            vmem_limit_bytes=int(vmem_limit),
        ),
        cost_estimate=pl.CostEstimate(
            flops=int(2 * R * H), transcendentals=int(R),
            bytes_accessed=int(R * H * xp.dtype.itemsize + R * 4)),
    )(xp)


# ----------------------------------------------- fused (K-tiled) RMSNorm + projections
def _rmsnorm_matmul_kernel(x_ref, g_ref, s_ref, w_ref, o_ref, acc_ref, *, input_dtype):
    @pl.when(pl.program_id(2) == 0)
    def _():
        acc_ref[...] = jnp.zeros_like(acc_ref)
    normed = x_ref[...].astype(jnp.float32) * s_ref[...]
    if input_dtype != jnp.float32:
        normed = normed.astype(input_dtype).astype(jnp.float32)
    normed = (g_ref[...].astype(jnp.float32) * normed).astype(w_ref.dtype)
    acc_ref[...] += jnp.dot(normed, w_ref[...], preferred_element_type=jnp.float32)

    @pl.when(pl.program_id(2) == pl.num_programs(2) - 1)
    def _():
        o_ref[...] = acc_ref[...].astype(o_ref.dtype)


def _rmsnorm_gateup_silu_kernel(x_ref, g_ref, s_ref, wg_ref, wu_ref, o_ref,
                                accg_ref, accu_ref, *, input_dtype):
    @pl.when(pl.program_id(2) == 0)
    def _():
        accg_ref[...] = jnp.zeros_like(accg_ref)
        accu_ref[...] = jnp.zeros_like(accu_ref)
    normed = x_ref[...].astype(jnp.float32) * s_ref[...]
    if input_dtype != jnp.float32:
        normed = normed.astype(input_dtype).astype(jnp.float32)
    normed = (g_ref[...].astype(jnp.float32) * normed).astype(wg_ref.dtype)
    accg_ref[...] += jnp.dot(normed, wg_ref[...], preferred_element_type=jnp.float32)
    accu_ref[...] += jnp.dot(normed, wu_ref[...], preferred_element_type=jnp.float32)

    @pl.when(pl.program_id(2) == pl.num_programs(2) - 1)
    def _():
        g = accg_ref[...]
        # act = silu(gate) * up computed ONCE at the producer
        o_ref[...] = (g * jax.nn.sigmoid(g) * accu_ref[...]).astype(o_ref.dtype)


def rmsnorm_matmul(x, g_p, w_list, *, n_real, k_real, tk, tn, eps, fuse_silu):
    """y = RMSNorm(x) @ w   (or silu(.@wg)*(.@wu)), K axis tiled, pre-padded weights."""
    d = _gen_defaults()
    orig_shape = x.shape
    dtype = x.dtype
    x2d = x.reshape(-1, k_real)
    R = x2d.shape[0]
    Kp, Np = w_list[0].shape
    assert Kp % tk == 0 and Np % tn == 0
    tm, Rp = _row_tile(R, d["tm"])
    xp = _pad2d(x2d, Rp, Kp)

    scale = _row_inv_rms(xp, R, k_real, tm, Rp, tk, Kp, eps, d["vmem_limit"])

    if fuse_silu:
        kernel = functools.partial(_rmsnorm_gateup_silu_kernel, input_dtype=dtype)
        scratch = [pltpu.VMEM((tm, tn), jnp.float32), pltpu.VMEM((tm, tn), jnp.float32)]
    else:
        kernel = functools.partial(_rmsnorm_matmul_kernel, input_dtype=dtype)
        scratch = [pltpu.VMEM((tm, tn), jnp.float32)]

    in_specs = [pl.BlockSpec((tm, tk), lambda i, j, k: (i, k)),
                pl.BlockSpec((1, tk), lambda i, j, k: (0, k)),
                pl.BlockSpec((tm, 1), lambda i, j, k: (i, 0))]
    in_specs += [pl.BlockSpec((tk, tn), lambda i, j, k: (k, j)) for _ in w_list]

    n_w = len(w_list)
    itemsize = jnp.dtype(dtype).itemsize
    cost = pl.CostEstimate(
        flops=int(2 * n_w * R * k_real * n_real + 3 * R * k_real),
        transcendentals=int(R * n_real if fuse_silu else 0),
        bytes_accessed=int(itemsize * (R * k_real * (Np // tn)
                                       + n_w * Kp * Np * (Rp // tm)
                                       + R * n_real)))

    out = pl.pallas_call(
        kernel,
        out_shape=jax.ShapeDtypeStruct((Rp, Np), dtype),
        grid_spec=pltpu.PrefetchScalarGridSpec(
            num_scalar_prefetch=0,
            grid=(Rp // tm, Np // tn, Kp // tk),
            in_specs=in_specs,
            out_specs=pl.BlockSpec((tm, tn), lambda i, j, k: (i, j)),
            scratch_shapes=scratch,
        ),
        compiler_params=pltpu.CompilerParams(
            dimension_semantics=("parallel", "parallel", "arbitrary"),
            vmem_limit_bytes=int(d["vmem_limit"]),
        ),
        cost_estimate=cost,
    )(xp, g_p, scale, *w_list)

    return out[:R, :n_real].reshape(orig_shape[:-1] + (n_real,))


# ------------------------------------------------------- tiled matmul + fused residual
def _matmul_residual_kernel(a_ref, w_ref, r_ref, o_ref, acc_ref):
    @pl.when(pl.program_id(2) == 0)
    def _():
        acc_ref[...] = jnp.zeros_like(acc_ref)
    acc_ref[...] += jnp.dot(a_ref[...], w_ref[...], preferred_element_type=jnp.float32)

    @pl.when(pl.program_id(2) == pl.num_programs(2) - 1)
    def _():
        o_ref[...] = (acc_ref[...] + r_ref[...].astype(jnp.float32)).astype(o_ref.dtype)


def matmul_residual(x, w_p, residual, *, n_real, k_real, tk, tn):
    """y = residual + x @ w   (w pre-padded to (Kp, Np); residual add fused in epilogue)."""
    d = _gen_defaults()
    orig_shape = residual.shape
    dtype = x.dtype
    x2d = x.reshape(-1, k_real)
    r2d = residual.reshape(-1, n_real)
    R = x2d.shape[0]
    Kp, Np = w_p.shape
    assert Kp % tk == 0 and Np % tn == 0
    tm, Rp = _row_tile(R, d["tm"])
    xp = _pad2d(x2d, Rp, Kp)
    rp = _pad2d(r2d, Rp, Np)

    itemsize = jnp.dtype(dtype).itemsize
    cost = pl.CostEstimate(
        flops=int(2 * R * k_real * n_real), transcendentals=0,
        bytes_accessed=int(itemsize * (R * k_real * (Np // tn) + Kp * Np * (Rp // tm)
                                       + 2 * R * n_real)))

    out = pl.pallas_call(
        _matmul_residual_kernel,
        out_shape=jax.ShapeDtypeStruct((Rp, Np), dtype),
        grid_spec=pltpu.PrefetchScalarGridSpec(
            num_scalar_prefetch=0,
            grid=(Rp // tm, Np // tn, Kp // tk),
            in_specs=[pl.BlockSpec((tm, tk), lambda i, j, k: (i, k)),
                      pl.BlockSpec((tk, tn), lambda i, j, k: (k, j)),
                      pl.BlockSpec((tm, tn), lambda i, j, k: (i, j))],
            out_specs=pl.BlockSpec((tm, tn), lambda i, j, k: (i, j)),
            scratch_shapes=[pltpu.VMEM((tm, tn), jnp.float32)],
        ),
        compiler_params=pltpu.CompilerParams(
            dimension_semantics=("parallel", "parallel", "arbitrary"),
            vmem_limit_bytes=int(d["vmem_limit"]),
        ),
        cost_estimate=cost,
    )(xp, w_p, rp)
    return out[:R, :n_real].reshape(orig_shape)


# ----------------------------------------------------- flash attention (online softmax)
def _flash_attn_kernel(q_ref, k_ref, v_ref, mask_ref, o_ref, m_sc, l_sc, acc_sc, *,
                       sm_scale):
    kv = pl.program_id(3)

    @pl.when(kv == 0)
    def _():
        m_sc[...] = jnp.full_like(m_sc, -1e30)
        l_sc[...] = jnp.zeros_like(l_sc)
        acc_sc[...] = jnp.zeros_like(acc_sc)

    q = q_ref[...].astype(jnp.float32)
    k = k_ref[...].astype(jnp.float32)
    s = jax.lax.dot_general(q, k, (((1,), (1,)), ((), ())),
                            preferred_element_type=jnp.float32) * sm_scale
    s = s + mask_ref[...].astype(jnp.float32)

    m_prev = m_sc[...]
    m_new = jnp.maximum(m_prev, jnp.max(s, axis=-1, keepdims=True))
    alpha = jnp.exp(m_prev - m_new)
    p = jnp.exp(s - m_new)
    l_sc[...] = alpha * l_sc[...] + jnp.sum(p, axis=-1, keepdims=True)
    acc_sc[...] = alpha * acc_sc[...] + jnp.dot(p.astype(v_ref.dtype), v_ref[...],
                                                preferred_element_type=jnp.float32)
    m_sc[...] = m_new

    @pl.when(kv == pl.num_programs(3) - 1)
    def _():
        o_ref[...] = (acc_sc[...] / l_sc[...]).astype(o_ref.dtype)


def flash_attention(q, k, v, mask, *, sm_scale):
    """Tiled online-softmax attention; GQA via K/V index_map (no repeat_kv copies)."""
    d = _gen_defaults()
    B, NH, S, D = q.shape
    NKV, Skv = k.shape[1], k.shape[2]
    n_rep = NH // NKV
    dtype = q.dtype

    if S <= 256:
        tq = _round_up(S, 8); Sq_p = tq
    else:
        tq = 256; Sq_p = _round_up(S, tq)
    if Skv <= 256:
        tk = _round_up(Skv, 8); Sk_p = tk
    else:
        tk = 256; Sk_p = _round_up(Skv, tk)

    def pad_seq(x, s_pad):
        if x.shape[2] == s_pad:
            return x
        return jnp.pad(x, [(0, 0), (0, 0), (0, s_pad - x.shape[2]), (0, 0)])

    qp = pad_seq(q, Sq_p)
    kp = pad_seq(k, Sk_p)
    vp = pad_seq(v, Sk_p)
    maskp = mask
    if mask.shape[2] != Sq_p or mask.shape[3] != Sk_p:
        maskp = jnp.pad(mask, [(0, 0), (0, 0), (0, Sq_p - mask.shape[2]),
                               (0, Sk_p - mask.shape[3])], constant_values=_NEG_INF)

    itemsize = jnp.dtype(dtype).itemsize
    cost = pl.CostEstimate(
        flops=int(4 * B * NH * S * Skv * D),
        transcendentals=int(B * NH * S * Skv),
        bytes_accessed=int(itemsize * (2 * B * NH * S * D + 2 * B * NKV * Skv * D
                                       + B * S * Skv)))

    out = pl.pallas_call(
        functools.partial(_flash_attn_kernel, sm_scale=sm_scale),
        out_shape=jax.ShapeDtypeStruct((B, NH, Sq_p, D), dtype),
        grid_spec=pltpu.PrefetchScalarGridSpec(
            num_scalar_prefetch=0,
            grid=(B, NH, Sq_p // tq, Sk_p // tk),
            in_specs=[
                pl.BlockSpec((None, None, tq, D), lambda b, h, qi, ki: (b, h, qi, 0)),
                pl.BlockSpec((None, None, tk, D),
                             lambda b, h, qi, ki: (b, h // n_rep, ki, 0)),
                pl.BlockSpec((None, None, tk, D),
                             lambda b, h, qi, ki: (b, h // n_rep, ki, 0)),
                pl.BlockSpec((None, None, tq, tk), lambda b, h, qi, ki: (b, 0, qi, ki)),
            ],
            out_specs=pl.BlockSpec((None, None, tq, D), lambda b, h, qi, ki: (b, h, qi, 0)),
            scratch_shapes=[pltpu.VMEM((tq, 1), jnp.float32),
                            pltpu.VMEM((tq, 1), jnp.float32),
                            pltpu.VMEM((tq, D), jnp.float32)],
        ),
        compiler_params=pltpu.CompilerParams(
            dimension_semantics=("parallel", "parallel", "parallel", "arbitrary"),
            vmem_limit_bytes=int(d["vmem_limit"]),
        ),
        cost_estimate=cost,
    )(qp, kp, vp, maskp)
    return out[:, :, :S, :]


# ------------------------------------------------------------------ rotary / JAX glue
def rotate_half(x):
    half = x.shape[-1] // 2
    return jnp.concatenate([-x[..., half:], x[..., :half]], axis=-1)


def apply_rotary_pos_emb(q, k, cos, sin, position_ids, unsqueeze_dim=1):
    cos = jnp.expand_dims(cos[position_ids], unsqueeze_dim)
    sin = jnp.expand_dims(sin[position_ids], unsqueeze_dim)
    q_embed = q * cos + rotate_half(q) * sin
    k_embed = k * cos + rotate_half(k) * sin
    return q_embed, k_embed


def repeat_kv(x, n_rep):
    b, kvh, s, d = x.shape
    if n_rep == 1:
        return x
    x = jnp.broadcast_to(x[:, :, None, :, :], (b, kvh, n_rep, s, d))
    return x.reshape(b, kvh * n_rep, s, d)


def rotary_tables(head_dim, seq_len, base, dtype):
    inv_freq = 1.0 / (base ** (jnp.arange(0, head_dim, 2, dtype=jnp.float32) / head_dim))
    t = jnp.arange(seq_len, dtype=jnp.float32)
    freqs = jnp.outer(t, inv_freq)
    emb = jnp.concatenate([freqs, freqs], axis=-1)
    return jnp.cos(emb).astype(dtype), jnp.sin(emb).astype(dtype)


# --------------------------------------------------------------- one-time parameter prep
def prepare_layer_params(params, cfg, dtype=jnp.float32):
    """Pre-concatenate QKV / gate|up weights, pre-pad to tile-aligned shapes, cache RoPE."""
    d = _gen_defaults()
    nh, nkv, hd = cfg["num_heads"], cfg["num_kv_heads"], cfg["head_dim"]
    H = params["wq"].shape[0]
    I = params["w_gate"].shape[1]
    N_qkv = (nh + 2 * nkv) * hd

    tk_h = min(d["tk"], _round_up(H, 128)); Kp_h = _round_up(H, tk_h)
    tk_i = min(d["tk"], _round_up(I, 128)); Kp_i = _round_up(I, tk_i)
    tn_qkv = min(d["tn"], _round_up(N_qkv, 128)); Np_qkv = _round_up(N_qkv, tn_qkv)
    tn_h = min(d["tn"], _round_up(H, 128)); Np_h = _round_up(H, tn_h)
    tn_i = min(d["tn"], _round_up(I, 128)); Np_i = _round_up(I, tn_i)

    w_qkv = jnp.concatenate([params["wq"], params["wk"], params["wv"]], axis=1)
    cos, sin = rotary_tables(hd, cfg["max_position_embeddings"], cfg["rope_theta"], dtype)

    return {
        "H": H, "I": I, "N_qkv": N_qkv,
        "tk_h": tk_h, "tk_i": tk_i, "tn_qkv": tn_qkv, "tn_h": tn_h, "tn_i": tn_i,
        "w_qkv_p": _pad2d(w_qkv, Kp_h, Np_qkv),
        "wo_p": _pad2d(params["wo"], Kp_h, Np_h),
        "w_gate_p": _pad2d(params["w_gate"], Kp_h, Np_i),
        "w_up_p": _pad2d(params["w_up"], Kp_h, Np_i),
        "w_down_p": _pad2d(params["w_down"], Kp_i, Np_h),
        "input_ln_p": _pad2d(params["input_ln"].reshape(1, H), 1, Kp_h),
        "post_ln_p": _pad2d(params["post_ln"].reshape(1, H), 1, Kp_h),
        "cos": cos, "sin": sin,
    }


# ------------------------------------------------------------- AdapterDecoderLayer fwd
def adapter_decoder_layer(prep, cfg, hidden_states, attention_mask, position_ids):
    bsz, q_len, H = hidden_states.shape
    nh, nkv, hd = cfg["num_heads"], cfg["num_kv_heads"], cfg["head_dim"]
    eps = cfg["rms_norm_eps"]

    # ---- attention block: input_layernorm fused into the pre-concatenated QKV matmul ----
    qkv = rmsnorm_matmul(hidden_states, prep["input_ln_p"], [prep["w_qkv_p"]],
                         n_real=prep["N_qkv"], k_real=H,
                         tk=prep["tk_h"], tn=prep["tn_qkv"], eps=eps, fuse_silu=False)
    q, k, v = jnp.split(qkv, [nh * hd, nh * hd + nkv * hd], axis=-1)
    q = q.reshape(bsz, q_len, nh, hd).transpose(0, 2, 1, 3)
    k = k.reshape(bsz, q_len, nkv, hd).transpose(0, 2, 1, 3)
    v = v.reshape(bsz, q_len, nkv, hd).transpose(0, 2, 1, 3)

    # RoPE tables are cached in prep.
    # TODO(synk): fuse RoPE into the QKV epilogue / flash Q,K load with pltpu.roll to
    # drop this extra Q/K HBM round trip.
    q, k = apply_rotary_pos_emb(q, k, prep["cos"], prep["sin"], position_ids)

    if attention_mask is None:
        attention_mask = jnp.zeros((bsz, 1, q_len, q_len), dtype=hidden_states.dtype)
    # TODO(synk): attention_dropout is not applied (inference-mode forward).
    attn_out = flash_attention(q, k, v, attention_mask, sm_scale=1.0 / math.sqrt(hd))
    attn_out = attn_out.transpose(0, 2, 1, 3).reshape(bsz, q_len, nh * hd)

    # o_proj with the residual add fused into its epilogue
    hidden1 = matmul_residual(attn_out, prep["wo_p"], hidden_states,
                              n_real=H, k_real=nh * hd, tk=prep["tk_h"], tn=prep["tn_h"])

    # ---- MLP: post_attention_layernorm fused into gate|up, SiLU*up emitted at producer,
    #      down_proj with fused residual ----
    act = rmsnorm_matmul(hidden1, prep["post_ln_p"], [prep["w_gate_p"], prep["w_up_p"]],
                         n_real=prep["I"], k_real=H,
                         tk=prep["tk_h"], tn=prep["tn_i"], eps=eps, fuse_silu=True)
    out = matmul_residual(act, prep["w_down_p"], hidden1,
                          n_real=H, k_real=prep["I"], tk=prep["tk_i"], tn=prep["tn_h"])
    return out


# ------------------------------------------------------------------ pure-JAX reference
def _rmsnorm_ref(x, w, eps):
    dt = x.dtype
    xf = x.astype(jnp.float32)
    var = jnp.mean(xf * xf, axis=-1, keepdims=True)
    xf = xf * jax.lax.rsqrt(var + eps)
    return w * xf.astype(dt)


def _reference_decoder_layer(params, cfg, hidden_states, attention_mask, position_ids):
    bsz, q_len, _ = hidden_states.shape
    nh, nkv, hd = cfg["num_heads"], cfg["num_kv_heads"], cfg["head_dim"]
    eps = cfg["rms_norm_eps"]

    residual = hidden_states
    h = _rmsnorm_ref(hidden_states, params["input_ln"], eps)
    q = h @ params["wq"]
    k = h @ params["wk"]
    v = h @ params["wv"]
    q = q.reshape(bsz, q_len, nh, hd).transpose(0, 2, 1, 3)
    k = k.reshape(bsz, q_len, nkv, hd).transpose(0, 2, 1, 3)
    v = v.reshape(bsz, q_len, nkv, hd).transpose(0, 2, 1, 3)
    cos, sin = rotary_tables(hd, q_len, cfg["rope_theta"], hidden_states.dtype)
    q, k = apply_rotary_pos_emb(q, k, cos, sin, position_ids)
    k = repeat_kv(k, nh // nkv)
    v = repeat_kv(v, nh // nkv)
    attn = jnp.einsum("bhqd,bhkd->bhqk", q, k) / math.sqrt(hd)
    attn = attn + attention_mask
    attn = jax.nn.softmax(attn.astype(jnp.float32), axis=-1).astype(q.dtype)
    attn_out = jnp.einsum("bhqk,bhkd->bhqd", attn, v)
    attn_out = attn_out.transpose(0, 2, 1, 3).reshape(bsz, q_len, nh * hd)
    attn_out = attn_out @ params["wo"]
    hidden = residual + attn_out

    residual = hidden
    h2 = _rmsnorm_ref(hidden, params["post_ln"], eps)
    gate = h2 @ params["w_gate"]
    up = h2 @ params["w_up"]
    mlp = (jax.nn.silu(gate) * up) @ params["w_down"]
    return residual + mlp


if __name__ == "__main__":
    key = jax.random.PRNGKey(0)
    batch, seq, hidden = 2, 8, 32
    num_heads, num_kv_heads = 4, 2
    head_dim = hidden // num_heads
    intermediate = 64
    eps = 1e-6
    cfg = dict(num_heads=num_heads, num_kv_heads=num_kv_heads, head_dim=head_dim,
               rms_norm_eps=eps, rope_theta=10000.0, max_position_embeddings=64)

    keys = jax.random.split(key, 9)
    x = jax.random.normal(keys[0], (batch, seq, hidden), dtype=jnp.float32)
    scale = 0.05
    params = {
        "input_ln": jnp.ones((hidden,), jnp.float32),
        "post_ln": jnp.ones((hidden,), jnp.float32),
        "wq": scale * jax.random.normal(keys[1], (hidden, num_heads * head_dim), jnp.float32),
        "wk": scale * jax.random.normal(keys[2], (hidden, num_kv_heads * head_dim), jnp.float32),
        "wv": scale * jax.random.normal(keys[3], (hidden, num_kv_heads * head_dim), jnp.float32),
        "wo": scale * jax.random.normal(keys[4], (num_heads * head_dim, hidden), jnp.float32),
        "w_gate": scale * jax.random.normal(keys[5], (hidden, intermediate), jnp.float32),
        "w_up": scale * jax.random.normal(keys[6], (hidden, intermediate), jnp.float32),
        "w_down": scale * jax.random.normal(keys[7], (intermediate, hidden), jnp.float32),
    }

    position_ids = jnp.broadcast_to(jnp.arange(seq)[None, :], (batch, seq))
    causal = jnp.tril(jnp.ones((seq, seq), dtype=bool))
    attention_mask = jnp.where(causal, 0.0, -1e9).astype(jnp.float32)[None, None]
    attention_mask = jnp.broadcast_to(attention_mask, (batch, 1, seq, seq))

    # One-time parameter prep (weight concat / pad, RoPE tables) -- hoisted off the hot path.
    prep = prepare_layer_params(params, cfg, dtype=jnp.float32)

    # 1) Standalone tiled RMSNorm kernel (AdapterRMSNorm.forward)
    ln_out = jax.block_until_ready(adapter_rms_norm(x, params["input_ln"], eps=eps))
    ln_ref = _rmsnorm_ref(x, params["input_ln"], eps)
    assert ln_out.shape == x.shape and ln_out.dtype == x.dtype
    assert jnp.allclose(ln_out, ln_ref, atol=1e-5, rtol=1e-5), "rmsnorm mismatch"

    # 2) Full AdapterDecoderLayer forward (fused norm+proj, flash attention, fused residuals)
    out = jax.block_until_ready(
        adapter_decoder_layer(prep, cfg, x, attention_mask, position_ids))
    ref = _reference_decoder_layer(params, cfg, x, attention_mask, position_ids)
    assert out.shape == x.shape and out.dtype == x.dtype
    assert jnp.allclose(out, ref, atol=2e-2, rtol=2e-2), "decoder layer mismatch vs reference"

    print("KERNEL_OK")
</pallas_src>

<mosaic_0001>
module attributes {stable_mosaic.version = 11 : i64} {
  func.func @_rmsnorm_kernel(%arg0: i32, %arg1: memref<16x128xf32, #tpu.memory_space<vmem>>, %arg2: memref<1x128xf32, #tpu.memory_space<vmem>>, %arg3: memref<16x128xf32, #tpu.memory_space<vmem>>) attributes {dimension_semantics = [#tpu.dimension_semantics<parallel>], iteration_bounds = array<i64: 1>, scalar_prefetch = 0 : i64, scratch_operands = 0 : i64, tpu.core_type = #tpu.core_type<tc>, window_params = [{transform_indices = @transform_0, window_bounds = array<i64: 16, 128>}, {pipeline_mode = #tpu.pipeline_mode<synchronous>, transform_indices = @transform_1, window_bounds = array<i64: 1, 128>}, {transform_indices = @transform_2, window_bounds = array<i64: 16, 128>}]} {
    %c0 = arith.constant 0 : index
    %c0_0 = arith.constant 0 : index
    %0 = vector.load %arg1[%c0, %c0_0] : memref<16x128xf32, #tpu.memory_space<vmem>>, vector<16x128xf32>
    %1 = arith.mulf %0, %0 : vector<16x128xf32>
    %cst = arith.constant dense<0.000000e+00> : vector<16xf32>
    %2 = vector.multi_reduction <add>, %1, %cst [1] : vector<16x128xf32> to vector<16xf32>
    %3 = vector.shape_cast %2 : vector<16xf32> to vector<16x1xf32>
    %cst_1 = arith.constant 3.125000e-02 : f32
    %4 = vector.broadcast %cst_1 : f32 to vector<16x1xf32>
    %5 = arith.mulf %3, %4 : vector<16x1xf32>
    %cst_2 = arith.constant 9.99999997E-7 : f32
    %6 = vector.broadcast %cst_2 : f32 to vector<16x1xf32>
    %7 = arith.addf %5, %6 : vector<16x1xf32>
    %8 = math.rsqrt %7 : vector<16x1xf32>
    %9 = vector.broadcast %8 : vector<16x1xf32> to vector<16x128xf32>
    %10 = arith.mulf %0, %9 : vector<16x128xf32>
    %c0_3 = arith.constant 0 : index
    %c0_4 = arith.constant 0 : index
    %11 = vector.load %arg2[%c0_3, %c0_4] : memref<1x128xf32, #tpu.memory_space<vmem>>, vector<1x128xf32>
    %12 = vector.broadcast %11 : vector<1x128xf32> to vector<16x128xf32>
    %13 = arith.mulf %12, %10 : vector<16x128xf32>
    %c0_5 = arith.constant 0 : index
    %c0_6 = arith.constant 0 : index
    %14 = vector.load %arg3[%c0_5, %c0_6] : memref<16x128xf32, #tpu.memory_space<vmem>>, vector<16x128xf32>
    tpu.vector_store %arg3[%c0_5, %c0_6], %13 {strides = array<i32>} : memref<16x128xf32, #tpu.memory_space<vmem>>, vector<16x128xf32>,
    return
  }
  func.func @transform_0(%arg0: i32) -> (i32, i32) {
    %c0_i32 = arith.constant 0 : i32
    %c0_i32_0 = arith.constant 0 : i32
    return %arg0, %c0_i32 : i32, i32
  }
  func.func @transform_1(%arg0: i32) -> (i32, i32) {
    %c0_i32 = arith.constant 0 : i32
    %c0_i32_0 = arith.constant 0 : i32
    %c0_i32_1 = arith.constant 0 : i32
    return %c0_i32, %c0_i32_0 : i32, i32
  }
  func.func @transform_2(%arg0: i32) -> (i32, i32) {
    %c0_i32 = arith.constant 0 : i32
    %c0_i32_0 = arith.constant 0 : i32
    return %arg0, %c0_i32 : i32, i32
  }
}

</mosaic_0001>

<bundles_post_ra>
// kernel: tpu_custom_call.1
= control target key start
LH: loop header
LB: loop body
LE: loop exit
PB: predicated region body
PF: predicated region fallthrough
CT: control target
= control target key end

     0   :  { %7 = vsyncpa [#allocation3], 0  ;;  %s179_s0 = inlined_call_operand.hbm [shape: f32[16,128], index: 0, kind: input, shape index: {}]   ;;  %s180_s1 = inlined_call_operand.vmem [shape: f32[1,128], index: 1, kind: input, shape index: {}]   ;;  %s181_s2 = inlined_call_operand.hbm [shape: f32[16,128], index: 2, kind: output, shape index: {}]  }
   0x1   :  { %8 = vsyncpa [#allocation4], 0  ;;  %s127_s9 = smov [#allocation2]   ;;  %s79_s13 = scalar_lea.hbm %s179_s0, 256 }
   0x2   :  { %s14_s10 = sshll.u32 %s127_s9, 4  ;;  %p80_p0 = scmp.ne.s32.totalorder %s179_s0, %s79_s13  ;;  %s15_s10 = int_to_ptr.vmem [resolvable:$true] %s14_s10 }
   0x3   :  { %p83_p1 = scmp.lt.u32.totalorder %s79_s13, %s179_s0 }
   0x5   :  { %p85_p2 = pnand %p83_p1, %p80_p0 }
   0x7   :  { %88 = shalt.err (!%p85_p2)
}
   0x8   :  { %s89_s18 = scalar_lea.vmem %s15_s10, 256  ;;  %p94_p4 = scmp.lt.s32.totalorder %s15_s10, %s15_s10 }
   0x9   :  { %p90_p3 = scmp.ne.s32.totalorder %s15_s10, %s89_s18  ;;  %p95_p5 = scmp.lt.s32.totalorder %s89_s18, %s89_s18 }
   0xb   :  { %p96_p6 = por %p95_p5, %p94_p4 }
   0xd   :  { %p97_p7 = pnand %p96_p6, %p90_p3 }
   0xf   :  { %100 = shalt.err (!%p97_p7)
}
  0x10   :  { %s128_s19 = smov 128   ;;  %s129_s20 = smov 8  }
  0x11   :  { %20 = dma.hbm_to_vmem [thread:$0]  %s179_s0, 256, %s15_s10, [#allocation3], %s128_s19, %s128_s19, %s129_s20  }
  0x12   :  { %123 = dma.done.wait [#allocation3], 256  }
  0x13   :  { %124 = vsyncadd [#allocation3], 4294967040  ;;  %v26_v0 = vld [vmem:[#allocation2] sm:$0xff]  ;;  %v27_v1 = vld [vmem:[#allocation2 + $0x8] sm:$0xff]  ;;  %s130_s0 = smov [#allocation5]  }
  0x14   :  { %v28_v2 = vmul.f32 %v26_v0, %v26_v0  ;;  %v29_v3 = vmul.f32 %v27_v1, %v27_v1  ;;  %v70_v11 = vld [vmem:[%s180_s1] ss:$0 sm:$0xff]  ;;  %s58_s25 = sshll.u32 %s130_s0, 4  ;;  %s59_s25 = int_to_ptr.vmem [resolvable:$true] %s58_s25 }
  0x15   :  { %s101_s26 = scalar_lea.vmem %s59_s25, 256  ;;  %p106_p9 = scmp.lt.s32.totalorder %s59_s25, %s59_s25 }
  0x16   :  { %30 = vadd.xlane.f32.xlu0 %v28_v2  ;;  %p102_p8 = scmp.ne.s32.totalorder %s59_s25, %s101_s26  ;;  %p107_p10 = scmp.lt.s32.totalorder %s101_s26, %s101_s26 }
  0x18   :  { %p108_p11 = por %p107_p10, %p106_p9 }
  0x1a   :  { %32 = vadd.xlane.f32.xlu0 %v29_v3  ;;  %p109_p12 = pnand %p108_p11, %p102_p8 }
  0xa3   :  { %v31_v4 = vpop.xlane.xlu0 %30 }
  0xa4   :  { %v34_v5 = vmul.f32 0.03125, %v31_v4 }
  0xa6   :  { %v36_v6 = vadd.f32 1e-06, %v34_v5 }
  0xa7   :  { %v33_v7 = vpop.xlane.xlu0 %32 }
  0xa8   :  { %75 = vrsqrt.f32 %v36_v6  ;;  %v35_v8 = vmul.f32 0.03125, %v33_v7 }
  0xaa   :  { %v37_v9 = vadd.f32 1e-06, %v35_v8 }
  0xac   :  { %77 = vrsqrt.f32 %v37_v9 }
  0xb2   :  { %v76_v10 = vpop.eup %75 }
  0xb3   :  { %v40_v12 = vmul.f32 %v76_v10, %v26_v0 }
  0xb5   :  { %v49_v13 = vmul.f32 %v70_v11, %v40_v12 }
  0xb6   :  { %v78_v14 = vpop.eup %77 }
  0xb7   :  { %v41_v15 = vmul.f32 %v78_v14, %v27_v1  ;;  %51 = vst [vmem:[#allocation5] sm:$0xff] %v49_v13 }
  0xb9   :  { %v50_v16 = vmul.f32 %v70_v11, %v41_v15 }
  0xbb   :  { %52 = vst [vmem:[#allocation5 + $0x8] sm:$0xff] %v50_v16 }
  0xbc   :  { %112 = shalt.err (!%p109_p12)
}
  0xbd   :  { %s113_s1 = scalar_lea.hbm %s181_s2, 256 }
  0xbe   :  { %p114_p13 = scmp.ne.s32.totalorder %s181_s2, %s113_s1  ;;  %p117_p0 = scmp.lt.u32.totalorder %s113_s1, %s181_s2 }
  0xc0   :  { %p119_p1 = pnand %p117_p0, %p114_p13 }
  0xc2   :  { %122 = shalt.err (!%p119_p1)
}
  0xc3   :  { %64 = dma.vmem_to_hbm [thread:$0]  %s59_s25, 256, %s181_s2, [#allocation4], %s128_s19, %s128_s19, %s129_s20  }
  0xc4   :  { %125 = dma.done.wait [#allocation4], 256  }
  0xc5   :  { %126 = vsyncadd [#allocation4], 4294967040 }
  0xc6   :  { %68 = vsyncpa [#allocation3], 1 }
  0xc7   :  { %69 = vsyncpa [#allocation4], 1 }

</bundles_post_ra>
